<compile_context>
chip_gen: v6e
topology: v6e:2x2x1
jax: 0.10.0
libtpu: 0.0.40
codegen_flags: <defaults>
</compile_context>

<pallas_src>
import functools

import jax
import jax.numpy as jnp
from jax.experimental import pallas as pl
from jax.experimental.pallas import tpu as pltpu


def _softplus(x):
    # numerically-stable softplus: log(1 + exp(x))
    return jnp.logaddexp(x, 0.0)


def _binary_approximator_kernel(u_ref, k_ref, km_ref, z_ref, *, gamma, zeta):
    # u tile: (tb, tc); k/km tiles: (1, tc) f32, broadcast over the sublane axis.
    u = u_ref[...].astype(jnp.float32)
    k = k_ref[...]
    km = km_ref[...]
    # s = sigmoid(log(u) - log(1-u) + shift) == u / (u*(1-k) + k),  k = exp(-shift)
    s = u / (u * km + k)
    mean_s = s * (zeta - gamma) + gamma
    z_ref[...] = jnp.clip(mean_s, 0.0, 1.0).astype(z_ref.dtype)


def _sublane_unit(dtype):
    # sublane packing unit per dtype width (f32: 8, bf16: 16, int8/fp8: 32)
    return {4: 8, 2: 16, 1: 32}.get(jnp.dtype(dtype).itemsize, 8)


def _per_buffer_cap_bytes():
    # v5e: keep streaming tiles at ~2 MiB (16 MiB scoped-VMEM default);
    # v6e / v7x: ~4 MiB per buffer amortizes the ~0.35 us per-grid-step overhead.
    try:
        kind = jax.devices()[0].device_kind.lower()
    except Exception:
        kind = ""
    if "v5" in kind:
        return 2 * 1024 * 1024
    return 4 * 1024 * 1024


def binary_approximator(u, alpha, beta, gamma=-0.1, zeta=1.1, *, tb=None, tc=None):
    """u: (B, coins) float in (0,1); alpha/beta: (1, coins) parameters."""
    B, C = u.shape
    assert alpha.shape == (1, C) and beta.shape == (1, C)

    # Hoist all transcendentals out of the kernel (single (1, C) f32 precompute).
    shift = jnp.log(_softplus(alpha.astype(jnp.float32))) / _softplus(beta.astype(jnp.float32))
    k = jnp.exp(-shift)          # (1, C) float32
    km = 1.0 - k                 # (1, C) float32

    itemsize = jnp.dtype(u.dtype).itemsize
    sub = _sublane_unit(u.dtype)
    cap = _per_buffer_cap_bytes()

    # Lane (coins) tile: prefer the full row (contiguous DMA, lane-dense stores,
    # 1-D grid over batch). Only tile coins when a minimal row-slab blows the cap.
    if tc is None:
        if C % 128 != 0 or C * itemsize * sub <= cap:
            tc = C
        else:
            tc = min(C, 8 * 1024)
            while C % tc != 0:
                tc -= 128

    # Sublane (batch) tile: multiple of the sublane unit, sized to the byte cap,
    # or the whole batch if it already fits (full-dim blocks are always legal).
    if tb is None:
        max_tb = max(sub, ((cap // max(1, tc * itemsize)) // sub) * sub)
        tb = B if B <= max_tb else max_tb

    grid_b = pl.cdiv(B, tb)
    grid_c = pl.cdiv(C, tc)

    kernel = functools.partial(
        _binary_approximator_kernel, gamma=float(gamma), zeta=float(zeta)
    )

    cost = pl.CostEstimate(
        flops=6 * B * C,
        transcendentals=0,
        bytes_accessed=2 * B * C * itemsize + 2 * C * 4,
    )

    if grid_c == 1:
        # 1-D grid over batch: batch is the (only) parallel axis -> trivially
        # splittable across v7x's two TensorCores; k/km stay resident.
        grid = (grid_b,)
        u_spec = pl.BlockSpec((tb, C), lambda i: (i, 0))
        kk_spec = pl.BlockSpec((1, C), lambda i: (0, 0))
        out_spec = pl.BlockSpec((tb, C), lambda i: (i, 0))
        dims = ("parallel",)
    else:
        # Batch LEADING so the megacore-splittable axis has the large extent.
        grid = (grid_b, grid_c)
        u_spec = pl.BlockSpec((tb, tc), lambda i, j: (i, j))
        kk_spec = pl.BlockSpec((1, tc), lambda i, j: (0, j))
        out_spec = pl.BlockSpec((tb, tc), lambda i, j: (i, j))
        dims = ("parallel", "parallel")

    return pl.pallas_call(
        kernel,
        out_shape=jax.ShapeDtypeStruct((B, C), u.dtype),
        grid_spec=pltpu.PrefetchScalarGridSpec(
            num_scalar_prefetch=0,
            grid=grid,
            in_specs=[u_spec, kk_spec, kk_spec],
            out_specs=out_spec,
        ),
        compiler_params=pltpu.CompilerParams(
            dimension_semantics=dims,
            vmem_limit_bytes=32 * 1024 * 1024,
        ),
        cost_estimate=cost,
    )(u, k, km)


def binary_approximator_ref(u, alpha, beta, gamma=-0.1, zeta=1.1):
    s = jax.nn.sigmoid(
        jnp.log(u) - jnp.log(1.0 - u) + jnp.log(_softplus(alpha)) / _softplus(beta)
    )
    mean_s = s * (zeta - gamma) + gamma
    return jnp.clip(mean_s, 0.0, 1.0)


if __name__ == "__main__":
    key = jax.random.PRNGKey(0)

    # Case 1: module-sized small shape (single grid step, full-row tile).
    batch, coins = 8, 128
    alpha = jnp.zeros((1, coins), jnp.float32) - 0.5   # matches nn.Parameter init
    beta = jnp.zeros((1, coins), jnp.float32) - 0.5
    # u must lie strictly in (0, 1) (reference uses log(u)/log(1-u))
    u = jax.random.uniform(key, (batch, coins), jnp.float32, minval=1e-3, maxval=1.0 - 1e-3)

    z = binary_approximator(u, alpha, beta)
    jax.block_until_ready(z)
    z_ref = binary_approximator_ref(u, alpha, beta)
    assert z.shape == (batch, coins)
    assert jnp.allclose(z, z_ref, atol=1e-5, rtol=1e-5)

    # Case 2: force a multi-step pipelined grid (tb=8 -> 3 batch steps) to
    # exercise the streaming/index-map path as well.
    key2 = jax.random.PRNGKey(1)
    b2, c2 = 24, 384
    a2 = jax.random.normal(key2, (1, c2), jnp.float32) * 0.3 - 0.5
    bt2 = jax.random.normal(jax.random.PRNGKey(2), (1, c2), jnp.float32) * 0.3 - 0.5
    u2 = jax.random.uniform(jax.random.PRNGKey(3), (b2, c2), jnp.float32,
                            minval=1e-3, maxval=1.0 - 1e-3)
    z2 = binary_approximator(u2, a2, bt2, tb=8)
    jax.block_until_ready(z2)
    assert jnp.allclose(z2, binary_approximator_ref(u2, a2, bt2), atol=1e-5, rtol=1e-5)

    print("KERNEL_OK")
</pallas_src>

<mosaic_0001>
module attributes {stable_mosaic.version = 11 : i64} {
  func.func @_binary_approximator_kernel(%arg0: i32, %arg1: memref<8x128xf32, #tpu.memory_space<vmem>>, %arg2: memref<1x128xf32, #tpu.memory_space<vmem>>, %arg3: memref<1x128xf32, #tpu.memory_space<vmem>>, %arg4: memref<8x128xf32, #tpu.memory_space<vmem>>) attributes {dimension_semantics = [#tpu.dimension_semantics<parallel>], iteration_bounds = array<i64: 1>, scalar_prefetch = 0 : i64, scratch_operands = 0 : i64, tpu.core_type = #tpu.core_type<tc>, window_params = [{transform_indices = @transform_0, window_bounds = array<i64: 8, 128>}, {pipeline_mode = #tpu.pipeline_mode<synchronous>, transform_indices = @transform_1, window_bounds = array<i64: 1, 128>}, {pipeline_mode = #tpu.pipeline_mode<synchronous>, transform_indices = @transform_2, window_bounds = array<i64: 1, 128>}, {transform_indices = @transform_3, window_bounds = array<i64: 8, 128>}]} {
    %c0 = arith.constant 0 : index
    %c0_0 = arith.constant 0 : index
    %0 = vector.load %arg1[%c0, %c0_0] : memref<8x128xf32, #tpu.memory_space<vmem>>, vector<8x128xf32>
    %c0_1 = arith.constant 0 : index
    %c0_2 = arith.constant 0 : index
    %1 = vector.load %arg2[%c0_1, %c0_2] : memref<1x128xf32, #tpu.memory_space<vmem>>, vector<1x128xf32>
    %c0_3 = arith.constant 0 : index
    %c0_4 = arith.constant 0 : index
    %2 = vector.load %arg3[%c0_3, %c0_4] : memref<1x128xf32, #tpu.memory_space<vmem>>, vector<1x128xf32>
    %3 = vector.broadcast %2 : vector<1x128xf32> to vector<8x128xf32>
    %4 = arith.mulf %0, %3 : vector<8x128xf32>
    %5 = vector.broadcast %1 : vector<1x128xf32> to vector<8x128xf32>
    %6 = arith.addf %4, %5 : vector<8x128xf32>
    %7 = arith.divf %0, %6 : vector<8x128xf32>
    %cst = arith.constant 1.200000e+00 : f32
    %8 = vector.broadcast %cst : f32 to vector<8x128xf32>
    %9 = arith.mulf %7, %8 : vector<8x128xf32>
    %cst_5 = arith.constant -1.000000e-01 : f32
    %10 = vector.broadcast %cst_5 : f32 to vector<8x128xf32>
    %11 = arith.addf %9, %10 : vector<8x128xf32>
    %cst_6 = arith.constant 0.000000e+00 : f32
    %cst_7 = arith.constant 1.000000e+00 : f32
    %12 = vector.broadcast %cst_6 : f32 to vector<8x128xf32>
    %13 = arith.maximumf %12, %11 : vector<8x128xf32>
    %14 = vector.broadcast %cst_7 : f32 to vector<8x128xf32>
    %15 = arith.minimumf %14, %13 : vector<8x128xf32>
    %c0_8 = arith.constant 0 : index
    %c0_9 = arith.constant 0 : index
    %16 = vector.load %arg4[%c0_8, %c0_9] : memref<8x128xf32, #tpu.memory_space<vmem>>, vector<8x128xf32>
    tpu.vector_store %arg4[%c0_8, %c0_9], %15 {strides = array<i32>} : memref<8x128xf32, #tpu.memory_space<vmem>>, vector<8x128xf32>,
    return
  }
  func.func @transform_0(%arg0: i32) -> (i32, i32) {
    %c0_i32 = arith.constant 0 : i32
    %c0_i32_0 = arith.constant 0 : i32
    return %arg0, %c0_i32 : i32, i32
  }
  func.func @transform_1(%arg0: i32) -> (i32, i32) {
    %c0_i32 = arith.constant 0 : i32
    %c0_i32_0 = arith.constant 0 : i32
    %c0_i32_1 = arith.constant 0 : i32
    return %c0_i32, %c0_i32_0 : i32, i32
  }
  func.func @transform_2(%arg0: i32) -> (i32, i32) {
    %c0_i32 = arith.constant 0 : i32
    %c0_i32_0 = arith.constant 0 : i32
    %c0_i32_1 = arith.constant 0 : i32
    return %c0_i32, %c0_i32_0 : i32, i32
  }
  func.func @transform_3(%arg0: i32) -> (i32, i32) {
    %c0_i32 = arith.constant 0 : i32
    %c0_i32_0 = arith.constant 0 : i32
    return %arg0, %c0_i32 : i32, i32
  }
}

</mosaic_0001>

<bundles_post_ra>
// kernel: tpu_custom_call.1
= control target key start
LH: loop header
LB: loop body
LE: loop exit
PB: predicated region body
PF: predicated region fallthrough
CT: control target
= control target key end

     0   :  { %8 = vsyncpa [#allocation3], 0  ;;  %s150_s0 = inlined_call_operand.hbm [shape: f32[8,128], index: 0, kind: input, shape index: {}]   ;;  %s151_s1 = inlined_call_operand.vmem [shape: f32[1,128], index: 1, kind: input, shape index: {}]   ;;  %s152_s2 = inlined_call_operand.vmem [shape: f32[1,128], index: 2, kind: input, shape index: {}]   ;;  %s153_s3 = inlined_call_operand.hbm [shape: f32[8,128], index: 3, kind: output, shape index: {}]  }
   0x1   :  { %9 = vsyncpa [#allocation4], 0  ;;  %s116_s12 = smov [#allocation2]  }
   0x2   :  { %s16_s13 = sshll.u32 %s116_s12, 4  ;;  %s17_s13 = int_to_ptr.vmem [resolvable:$true] %s16_s13 }
   0x3   :  { %s80_s14 = scalar_lea.vmem %s17_s13, 128  ;;  %p85_p1 = scmp.lt.s32.totalorder %s17_s13, %s17_s13 }
   0x4   :  { %p81_p0 = scmp.ne.s32.totalorder %s17_s13, %s80_s14  ;;  %p86_p2 = scmp.lt.s32.totalorder %s80_s14, %s80_s14 }
   0x6   :  { %p87_p3 = por %p86_p2, %p85_p1 }
   0x8   :  { %p88_p4 = pnand %p87_p3, %p81_p0 }
   0xa   :  { %91 = shalt.err (!%p88_p4)
}
   0xb   :  { %19 = dma.hbm_to_vmem [thread:$0]  %s150_s0, 128, %s17_s13, [#allocation3]  }
   0xc   :  { %112 = dma.done.wait [#allocation3], 128  }
   0xd   :  { %113 = vsyncadd [#allocation3], 4294967168  ;;  %v27_v0 = vld [vmem:[#allocation2] sm:$0xff]  ;;  %s117_s21 = smov [#allocation5]  }
   0xe   :  { %v67_v1 = vld [vmem:[%s151_s1] ss:$0 sm:$0xff]  ;;  %s57_s0 = sshll.u32 %s117_s21, 4  ;;  %s58_s0 = int_to_ptr.vmem [resolvable:$true] %s57_s0 }
   0xf   :  { %v66_v2 = vld [vmem:[%s152_s2] ss:$0 sm:$0xff]  ;;  %s92_s22 = scalar_lea.vmem %s58_s0, 128  ;;  %p97_p6 = scmp.lt.s32.totalorder %s58_s0, %s58_s0 }
  0x10   :  { %v36_v3 = vmul.f32 %v66_v2, %v27_v0  ;;  %p93_p5 = scmp.ne.s32.totalorder %s58_s0, %s92_s22  ;;  %p98_p7 = scmp.lt.s32.totalorder %s92_s22, %s92_s22 }
  0x12   :  { %v43_v4 = vadd.f32 %v67_v1, %v36_v3  ;;  %p99_p8 = por %p98_p7, %p97_p6 }
  0x14   :  { %70 = vrcp.f32 %v43_v4  ;;  %p100_p9 = pnand %p99_p8, %p93_p5 }
  0x21   :  { %v71_v5 = vpop.eup %70 }
  0x22   :  { %v45_v6 = vmul.f32 %v71_v5, %v27_v0 }
  0x24   :  { %v46_v7 = vmul.f32 1.2, %v45_v6 }
  0x26   :  { %v47_v8 = vadd.f32 -0.1, %v46_v7 }
  0x28   :  { %v48_v9 = vmax.f32 %v47_v8, 0.0 }
  0x2a   :  { %v49_v10 = vmin.f32 %v48_v9, 1.0 }
  0x2c   :  { %50 = vst [vmem:[#allocation5] sm:$0xff] %v49_v10 }
  0x2d   :  { %103 = shalt.err (!%p100_p9)
}
  0x2e   :  { %60 = dma.vmem_to_hbm [thread:$0]  %s58_s0, 128, %s153_s3, [#allocation4]  }
  0x2f   :  { %114 = dma.done.wait [#allocation4], 128  }
  0x30   :  { %115 = vsyncadd [#allocation4], 4294967168 }
  0x31   :  { %64 = vsyncpa [#allocation3], 1 }
  0x32   :  { %65 = vsyncpa [#allocation4], 1 }

</bundles_post_ra>
